<compile_context>
chip_gen: v7x
topology: tpu7x:2x2x1
jax: 0.10.0
libtpu: 0.0.40
codegen_flags: <defaults>
</compile_context>

<pallas_src>
import jax
import jax.numpy as jnp
from jax.experimental import pallas as pl
from jax.experimental.pallas import tpu as pltpu


_LANE = 128                    # vreg lane width
_SUBLANE = 8                   # vreg sublane count (f32)
_TILE_N_TARGET = 512           # rows per grid step, large-H regime
_TILE_N_TARGET_SMALL_H = 1024  # rows per grid step when H_pad <= 256 (HBM-bound)


def _round_up(x: int, m: int) -> int:
    return ((x + m - 1) // m) * m


def _vmem_capacity_bytes() -> int:
    try:
        return int(pltpu.get_tpu_info().vmem_capacity_bytes)
    except Exception:
        return 64 << 20  # conservative: v7x per-TensorCore VMEM


def _make_mlp_kernel(num_hidden: int):
    """Fused MLP kernel for `num_hidden` (= layer_num - 1) hidden layers."""

    def kernel(*refs):
        # refs = (x_ref, w_1, b_1, ..., w_nh, b_nh, wv, bv, o_ref)
        x_ref, o_ref = refs[0], refs[-1]
        p = refs[1:-1]

        h = x_ref[...]                                   # native dtype (e.g. f32)
        for li in range(num_hidden):
            w_ref, b_ref = p[2 * li], p[2 * li + 1]
            # Cast to the weight (MXU) dtype right before the matmul; accumulate f32.
            acc = jnp.dot(h.astype(w_ref.dtype), w_ref[...],
                          preferred_element_type=jnp.float32)
            h = jnp.maximum(acc + b_ref[...], 0.0)       # f32 bias add + ReLU (VPU)

        wv_ref, bv_ref = p[-2], p[-1]
        y = jnp.dot(h.astype(wv_ref.dtype), wv_ref[...],
                    preferred_element_type=jnp.float32) + bv_ref[...]
        o_ref[...] = y.astype(o_ref.dtype)

    return kernel


def mlp_pallas(x, u_weights, u_biases, wv, bv, *,
               compute_dtype=jnp.bfloat16, out_store_dtype=None):
    """MLP forward pass.

    x              : [B, S, H]
    u_weights[i]   : [H, H]  stored as (in, out), i.e. PyTorch weight.T
    u_biases[i]    : [H]
    wv             : [H, O]  (in, out)
    bv             : [O]
    compute_dtype  : MXU input dtype (default bf16; accumulation is always f32)
    out_store_dtype: dtype of the kernel's HBM output store (default x.dtype);
                     result is cast back to x.dtype after slicing.
    returns        : [B, S, O] in x.dtype
    """
    assert len(u_weights) == len(u_biases)
    num_hidden = len(u_weights)

    B, S, H = x.shape
    for w, b in zip(u_weights, u_biases):
        assert w.shape == (H, H) and b.shape == (H,), \
            "hidden weights must be (in=H, out=H) = torch weight.T"
    assert wv.shape[0] == H, "V weight must be (in=H, out=O) = torch weight.T"
    O = wv.shape[1]
    N = B * S

    out_dtype = x.dtype
    cdt = jnp.dtype(compute_dtype if compute_dtype is not None else x.dtype)
    sdt = jnp.dtype(out_store_dtype if out_store_dtype is not None else out_dtype)

    H_pad = _round_up(H, _LANE)
    O_pad = _round_up(O, _LANE)

    # x stream: only materialize a padded copy when the feature dim needs lane
    # padding; the row dim is never padded (Pallas masks the partial edge block),
    # and the bf16 cast happens in-kernel, so no extra HBM pass over x.
    xs = x.reshape(N, H)
    if H_pad != H:
        x2d = jnp.zeros((N, H_pad), xs.dtype).at[:, :H].set(xs)
    else:
        x2d = xs
    xbytes = jnp.dtype(x2d.dtype).itemsize

    def _pad_w(w, rows, cols):
        w = w.astype(cdt)
        if w.shape == (rows, cols):
            return w
        return jnp.zeros((rows, cols), cdt).at[:w.shape[0], :w.shape[1]].set(w)

    def _pad_b(b, cols):
        b = b.astype(jnp.float32)  # biases stay f32: added to the f32 accumulator
        if b.shape[0] == cols:
            return b.reshape(1, cols)
        return jnp.zeros((1, cols), jnp.float32).at[0, :b.shape[0]].set(b)

    # NOTE: for repeated inference, jit the caller (or hoist these pads/casts) so
    # XLA constant-folds the padded weights instead of rebuilding them per call.
    padded = []
    for w, b in zip(u_weights, u_biases):
        padded.append((_pad_w(w, H_pad, H_pad), (H_pad, H_pad)))
        padded.append((_pad_b(b, H_pad), (1, H_pad)))
    padded.append((_pad_w(wv, H_pad, O_pad), (H_pad, O_pad)))
    padded.append((_pad_b(bv, O_pad), (1, O_pad)))

    obytes = sdt.itemsize
    vmem_cap = _vmem_capacity_bytes()

    def _call(single_buffer_weights: bool):
        wbuf = 1 if single_buffer_weights else 2
        resident = wbuf * sum(int(p.size) * p.dtype.itemsize for p, _ in padded)
        budget = int(0.70 * vmem_cap)
        # TODO(synk): if `resident` ever exceeds `budget` (production H >= ~1024 /
        # many layers, esp. v7x's 64 MiB VMEM), add a K grid axis + f32 VMEM
        # accumulator (or stream weights) instead of keeping them fully resident.

        per_row = 2 * H_pad * xbytes + 2 * O_pad * obytes  # double-buffered x + out
        avail = max(budget - resident, per_row * _SUBLANE)
        max_tile = max(_SUBLANE, (avail // per_row) // _SUBLANE * _SUBLANE)

        target = _TILE_N_TARGET_SMALL_H if H_pad <= 256 else _TILE_N_TARGET
        tile_n = max(_SUBLANE,
                     (min(target, max_tile, _round_up(N, _SUBLANE))
                      // _SUBLANE) * _SUBLANE)
        # Guarantee >= 2 grid steps so both v7x TensorCores get work
        # (grid axis is "parallel"); neutral on v5e/v6e.
        if pl.cdiv(N, tile_n) < 2 and N > _SUBLANE:
            tile_n = max(_SUBLANE, _round_up(pl.cdiv(N, 2), _SUBLANE))
        grid = (pl.cdiv(N, tile_n),)

        # Capacity-aware scoped-VMEM override (defaults are 16/32 MiB, well below
        # physical on v5e/v6e; v7x physical is only 64 MiB per TensorCore).
        est = resident + tile_n * per_row + (1 << 20)
        vmem_limit = int(min(vmem_cap, max(int(1.5 * est), 32 << 20)))

        pmode = pl.Buffered(1) if single_buffer_weights else None
        in_specs = [pl.BlockSpec((tile_n, H_pad), lambda i: (i, 0))]
        for _, shape in padded:
            if pmode is not None:
                in_specs.append(pl.BlockSpec(shape, lambda i: (0, 0),
                                             pipeline_mode=pmode))
            else:
                in_specs.append(pl.BlockSpec(shape, lambda i: (0, 0)))

        return pl.pallas_call(
            _make_mlp_kernel(num_hidden),
            out_shape=jax.ShapeDtypeStruct((N, O_pad), sdt),
            grid=grid,
            in_specs=in_specs,
            out_specs=pl.BlockSpec((tile_n, O_pad), lambda i: (i, 0)),
            compiler_params=pltpu.CompilerParams(
                dimension_semantics=("parallel",),
                vmem_limit_bytes=vmem_limit,
            ),
        )(x2d, *(p for p, _ in padded))

    try:
        out2d = _call(True)    # single-buffered weights (constant index_map)
    except Exception:
        # pl.Buffered(1) not supported by this JAX build -> default double buffering.
        out2d = _call(False)

    return out2d[:, :O].astype(out_dtype).reshape(B, S, O)


def reference_mlp(x, u_weights, u_biases, wv, bv):
    h = x
    for w, b in zip(u_weights, u_biases):
        h = jnp.maximum(jnp.einsum("bsh,hk->bsk", h, w) + b, 0.0)
    return jnp.einsum("bsh,ho->bso", h, wv) + bv


if __name__ == "__main__":
    batch, seq, hidden_dim, output_dim = 2, 8, 32, 16
    key = jax.random.PRNGKey(0)
    kx, kw1, kb1, kw2, kb2, kwv, kbv = jax.random.split(key, 7)

    x = jax.random.normal(kx, (batch, seq, hidden_dim), dtype=jnp.float32)
    w1 = 0.1 * jax.random.normal(kw1, (hidden_dim, hidden_dim), dtype=jnp.float32)
    b1 = 0.1 * jax.random.normal(kb1, (hidden_dim,), dtype=jnp.float32)
    w2 = 0.1 * jax.random.normal(kw2, (hidden_dim, hidden_dim), dtype=jnp.float32)
    b2 = 0.1 * jax.random.normal(kb2, (hidden_dim,), dtype=jnp.float32)
    wv = 0.1 * jax.random.normal(kwv, (hidden_dim, output_dim), dtype=jnp.float32)
    bv = 0.1 * jax.random.normal(kbv, (output_dim,), dtype=jnp.float32)

    # ----- layer_num = 2, default bf16 MXU inputs (f32 accumulation) -----
    y = mlp_pallas(x, [w1], [b1], wv, bv)
    jax.block_until_ready(y)
    y_ref = reference_mlp(x, [w1], [b1], wv, bv)
    assert y.shape == (batch, seq, output_dim)
    assert jnp.allclose(y, y_ref, atol=5e-2, rtol=5e-2), "mismatch (layer_num=2, bf16)"

    # ----- layer_num = 3, full f32 MXU inputs -> tight tolerance -----
    y3 = mlp_pallas(x, [w1, w2], [b1, b2], wv, bv, compute_dtype=jnp.float32)
    jax.block_until_ready(y3)
    y3_ref = reference_mlp(x, [w1, w2], [b1, b2], wv, bv)
    assert jnp.allclose(y3, y3_ref, atol=1e-5, rtol=1e-5), "mismatch (layer_num=3, f32)"

    # ----- lane-aligned H: no x padding copy, >=2 row tiles, bf16 output store -----
    Ha = 128
    ka = jax.random.split(kbv, 5)
    xa = jax.random.normal(ka[0], (2, 64, Ha), dtype=jnp.float32)
    wa = 0.1 * jax.random.normal(ka[1], (Ha, Ha), dtype=jnp.float32)
    ba = 0.1 * jax.random.normal(ka[2], (Ha,), dtype=jnp.float32)
    wva = 0.1 * jax.random.normal(ka[3], (Ha, output_dim), dtype=jnp.float32)
    bva = 0.1 * jax.random.normal(ka[4], (output_dim,), dtype=jnp.float32)
    ya = mlp_pallas(xa, [wa], [ba], wva, bva, out_store_dtype=jnp.bfloat16)
    jax.block_until_ready(ya)
    ya_ref = reference_mlp(xa, [wa], [ba], wva, bva)
    assert ya.shape == (2, 64, output_dim)
    assert jnp.allclose(ya, ya_ref, atol=8e-2, rtol=8e-2), "mismatch (aligned H, bf16)"

    print("KERNEL_OK")
</pallas_src>

<mosaic_0001>
module attributes {stable_mosaic.version = 11 : i64} {
  func.func @kernel(%arg0: i32, %arg1: memref<8x128xf32, #tpu.memory_space<vmem>>, %arg2: memref<128x128xbf16, #tpu.memory_space<vmem>>, %arg3: memref<1x128xf32, #tpu.memory_space<vmem>>, %arg4: memref<128x128xbf16, #tpu.memory_space<vmem>>, %arg5: memref<1x128xf32, #tpu.memory_space<vmem>>, %arg6: memref<8x128xf32, #tpu.memory_space<vmem>>) attributes {dimension_semantics = [#tpu.dimension_semantics<parallel>], iteration_bounds = array<i64: 2>, scalar_prefetch = 0 : i64, scratch_operands = 0 : i64, tpu.core_type = #tpu.core_type<tc>, window_params = [{transform_indices = @transform_0, window_bounds = array<i64: 8, 128>}, {pipeline_mode = #tpu.pipeline_mode<synchronous>, transform_indices = @transform_1, window_bounds = array<i64: 128, 128>}, {pipeline_mode = #tpu.pipeline_mode<synchronous>, transform_indices = @transform_2, window_bounds = array<i64: 1, 128>}, {pipeline_mode = #tpu.pipeline_mode<synchronous>, transform_indices = @transform_3, window_bounds = array<i64: 128, 128>}, {pipeline_mode = #tpu.pipeline_mode<synchronous>, transform_indices = @transform_4, window_bounds = array<i64: 1, 128>}, {transform_indices = @transform_5, window_bounds = array<i64: 8, 128>}]} {
    %c0 = arith.constant 0 : index
    %c0_0 = arith.constant 0 : index
    %0 = vector.load %arg1[%c0, %c0_0] : memref<8x128xf32, #tpu.memory_space<vmem>>, vector<8x128xf32>
    %1 = arith.truncf %0 : vector<8x128xf32> to vector<8x128xbf16>
    %c0_1 = arith.constant 0 : index
    %c0_2 = arith.constant 0 : index
    %2 = vector.load %arg2[%c0_1, %c0_2] : memref<128x128xbf16, #tpu.memory_space<vmem>>, vector<128x128xbf16>
    %cst = arith.constant dense<0.000000e+00> : vector<8x128xf32>
    %3 = tpu.matmul %1, %2, %cst {dimension_numbers = #tpu.dot_dimension_numbers<[1], [0], [0], [1], [0, 0, 1, 1], [], []>} : vector<8x128xbf16>, vector<128x128xbf16>, vector<8x128xf32> -> vector<8x128xf32>
    %c0_3 = arith.constant 0 : index
    %c0_4 = arith.constant 0 : index
    %4 = vector.load %arg3[%c0_3, %c0_4] : memref<1x128xf32, #tpu.memory_space<vmem>>, vector<1x128xf32>
    %5 = vector.broadcast %4 : vector<1x128xf32> to vector<8x128xf32>
    %6 = arith.addf %3, %5 : vector<8x128xf32>
    %cst_5 = arith.constant 0.000000e+00 : f32
    %7 = vector.broadcast %cst_5 : f32 to vector<8x128xf32>
    %8 = arith.maximumf %6, %7 : vector<8x128xf32>
    %9 = arith.truncf %8 : vector<8x128xf32> to vector<8x128xbf16>
    %c0_6 = arith.constant 0 : index
    %c0_7 = arith.constant 0 : index
    %10 = vector.load %arg4[%c0_6, %c0_7] : memref<128x128xbf16, #tpu.memory_space<vmem>>, vector<128x128xbf16>
    %cst_8 = arith.constant dense<0.000000e+00> : vector<8x128xf32>
    %11 = tpu.matmul %9, %10, %cst_8 {dimension_numbers = #tpu.dot_dimension_numbers<[1], [0], [0], [1], [0, 0, 1, 1], [], []>} : vector<8x128xbf16>, vector<128x128xbf16>, vector<8x128xf32> -> vector<8x128xf32>
    %c0_9 = arith.constant 0 : index
    %c0_10 = arith.constant 0 : index
    %12 = vector.load %arg5[%c0_9, %c0_10] : memref<1x128xf32, #tpu.memory_space<vmem>>, vector<1x128xf32>
    %13 = vector.broadcast %12 : vector<1x128xf32> to vector<8x128xf32>
    %14 = arith.addf %11, %13 : vector<8x128xf32>
    %c0_11 = arith.constant 0 : index
    %c0_12 = arith.constant 0 : index
    %15 = vector.load %arg6[%c0_11, %c0_12] : memref<8x128xf32, #tpu.memory_space<vmem>>, vector<8x128xf32>
    tpu.vector_store %arg6[%c0_11, %c0_12], %14 {strides = array<i32>} : memref<8x128xf32, #tpu.memory_space<vmem>>, vector<8x128xf32>,
    return
  }
  func.func @transform_0(%arg0: i32) -> (i32, i32) {
    %c0_i32 = arith.constant 0 : i32
    %c0_i32_0 = arith.constant 0 : i32
    return %arg0, %c0_i32 : i32, i32
  }
  func.func @transform_1(%arg0: i32) -> (i32, i32) {
    %c0_i32 = arith.constant 0 : i32
    %c0_i32_0 = arith.constant 0 : i32
    %c0_i32_1 = arith.constant 0 : i32
    return %c0_i32, %c0_i32_0 : i32, i32
  }
  func.func @transform_2(%arg0: i32) -> (i32, i32) {
    %c0_i32 = arith.constant 0 : i32
    %c0_i32_0 = arith.constant 0 : i32
    %c0_i32_1 = arith.constant 0 : i32
    return %c0_i32, %c0_i32_0 : i32, i32
  }
  func.func @transform_3(%arg0: i32) -> (i32, i32) {
    %c0_i32 = arith.constant 0 : i32
    %c0_i32_0 = arith.constant 0 : i32
    %c0_i32_1 = arith.constant 0 : i32
    return %c0_i32, %c0_i32_0 : i32, i32
  }
  func.func @transform_4(%arg0: i32) -> (i32, i32) {
    %c0_i32 = arith.constant 0 : i32
    %c0_i32_0 = arith.constant 0 : i32
    %c0_i32_1 = arith.constant 0 : i32
    return %c0_i32, %c0_i32_0 : i32, i32
  }
  func.func @transform_5(%arg0: i32) -> (i32, i32) {
    %c0_i32 = arith.constant 0 : i32
    %c0_i32_0 = arith.constant 0 : i32
    return %arg0, %c0_i32 : i32, i32
  }
}

module attributes {stable_mosaic.version = 11 : i64} {
  func.func @kernel(%arg0: i32, %arg1: memref<8x128xf32, #tpu.memory_space<vmem>>, %arg2: memref<128x128xbf16, #tpu.memory_space<vmem>>, %arg3: memref<1x128xf32, #tpu.memory_space<vmem>>, %arg4: memref<128x128xbf16, #tpu.memory_space<vmem>>, %arg5: memref<1x128xf32, #tpu.memory_space<vmem>>, %arg6: memref<8x128xf32, #tpu.memory_space<vmem>>) attributes {dimension_semantics = [#tpu.dimension_semantics<parallel>], iteration_bounds = array<i64: 2>, scalar_prefetch = 0 : i64, scratch_operands = 0 : i64, tpu.core_type = #tpu.core_type<tc>, window_params = [{transform_indices = @transform_0, window_bounds = array<i64: 8, 128>}, {pipeline_mode = #tpu.pipeline_mode<synchronous>, transform_indices = @transform_1, window_bounds = array<i64: 128, 128>}, {pipeline_mode = #tpu.pipeline_mode<synchronous>, transform_indices = @transform_2, window_bounds = array<i64: 1, 128>}, {pipeline_mode = #tpu.pipeline_mode<synchronous>, transform_indices = @transform_3, window_bounds = array<i64: 128, 128>}, {pipeline_mode = #tpu.pipeline_mode<synchronous>, transform_indices = @transform_4, window_bounds = array<i64: 1, 128>}, {transform_indices = @transform_5, window_bounds = array<i64: 8, 128>}]} {
    %c0 = arith.constant 0 : index
    %c0_0 = arith.constant 0 : index
    %0 = vector.load %arg1[%c0, %c0_0] : memref<8x128xf32, #tpu.memory_space<vmem>>, vector<8x128xf32>
    %1 = arith.truncf %0 : vector<8x128xf32> to vector<8x128xbf16>
    %c0_1 = arith.constant 0 : index
    %c0_2 = arith.constant 0 : index
    %2 = vector.load %arg2[%c0_1, %c0_2] : memref<128x128xbf16, #tpu.memory_space<vmem>>, vector<128x128xbf16>
    %cst = arith.constant dense<0.000000e+00> : vector<8x128xf32>
    %3 = tpu.matmul %1, %2, %cst {dimension_numbers = #tpu.dot_dimension_numbers<[1], [0], [0], [1], [0, 0, 1, 1], [], []>} : vector<8x128xbf16>, vector<128x128xbf16>, vector<8x128xf32> -> vector<8x128xf32>
    %c0_3 = arith.constant 0 : index
    %c0_4 = arith.constant 0 : index
    %4 = vector.load %arg3[%c0_3, %c0_4] : memref<1x128xf32, #tpu.memory_space<vmem>>, vector<1x128xf32>
    %5 = vector.broadcast %4 : vector<1x128xf32> to vector<8x128xf32>
    %6 = arith.addf %3, %5 : vector<8x128xf32>
    %cst_5 = arith.constant 0.000000e+00 : f32
    %7 = vector.broadcast %cst_5 : f32 to vector<8x128xf32>
    %8 = arith.maximumf %6, %7 : vector<8x128xf32>
    %9 = arith.truncf %8 : vector<8x128xf32> to vector<8x128xbf16>
    %c0_6 = arith.constant 0 : index
    %c0_7 = arith.constant 0 : index
    %10 = vector.load %arg4[%c0_6, %c0_7] : memref<128x128xbf16, #tpu.memory_space<vmem>>, vector<128x128xbf16>
    %cst_8 = arith.constant dense<0.000000e+00> : vector<8x128xf32>
    %11 = tpu.matmul %9, %10, %cst_8 {dimension_numbers = #tpu.dot_dimension_numbers<[1], [0], [0], [1], [0, 0, 1, 1], [], []>} : vector<8x128xbf16>, vector<128x128xbf16>, vector<8x128xf32> -> vector<8x128xf32>
    %c0_9 = arith.constant 0 : index
    %c0_10 = arith.constant 0 : index
    %12 = vector.load %arg5[%c0_9, %c0_10] : memref<1x128xf32, #tpu.memory_space<vmem>>, vector<1x128xf32>
    %13 = vector.broadcast %12 : vector<1x128xf32> to vector<8x128xf32>
    %14 = arith.addf %11, %13 : vector<8x128xf32>
    %c0_11 = arith.constant 0 : index
    %c0_12 = arith.constant 0 : index
    %15 = vector.load %arg6[%c0_11, %c0_12] : memref<8x128xf32, #tpu.memory_space<vmem>>, vector<8x128xf32>
    tpu.vector_store %arg6[%c0_11, %c0_12], %14 {strides = array<i32>} : memref<8x128xf32, #tpu.memory_space<vmem>>, vector<8x128xf32>,
    return
  }
  func.func @transform_0(%arg0: i32) -> (i32, i32) {
    %c0_i32 = arith.constant 0 : i32
    %c0_i32_0 = arith.constant 0 : i32
    return %arg0, %c0_i32 : i32, i32
  }
  func.func @transform_1(%arg0: i32) -> (i32, i32) {
    %c0_i32 = arith.constant 0 : i32
    %c0_i32_0 = arith.constant 0 : i32
    %c0_i32_1 = arith.constant 0 : i32
    return %c0_i32, %c0_i32_0 : i32, i32
  }
  func.func @transform_2(%arg0: i32) -> (i32, i32) {
    %c0_i32 = arith.constant 0 : i32
    %c0_i32_0 = arith.constant 0 : i32
    %c0_i32_1 = arith.constant 0 : i32
    return %c0_i32, %c0_i32_0 : i32, i32
  }
  func.func @transform_3(%arg0: i32) -> (i32, i32) {
    %c0_i32 = arith.constant 0 : i32
    %c0_i32_0 = arith.constant 0 : i32
    %c0_i32_1 = arith.constant 0 : i32
    return %c0_i32, %c0_i32_0 : i32, i32
  }
  func.func @transform_4(%arg0: i32) -> (i32, i32) {
    %c0_i32 = arith.constant 0 : i32
    %c0_i32_0 = arith.constant 0 : i32
    %c0_i32_1 = arith.constant 0 : i32
    return %c0_i32, %c0_i32_0 : i32, i32
  }
  func.func @transform_5(%arg0: i32) -> (i32, i32) {
    %c0_i32 = arith.constant 0 : i32
    %c0_i32_0 = arith.constant 0 : i32
    return %arg0, %c0_i32 : i32, i32
  }
}

</mosaic_0001>

<bundles_post_ra>
// kernel: tpu_custom_call.1
= control target key start
LH: loop header
LB: loop body
LE: loop exit
PB: predicated region body
PF: predicated region fallthrough
CT: control target
= control target key end

     0   :  { %10 = vsyncpa [#allocation3], 0  ;;  %s1217_s0 = inlined_call_operand.hbm [shape: f32[16,128], index: 0, kind: input, shape index: {}]   ;;  %s1218_s1 = inlined_call_operand.hbm [shape: bf16[128,128], index: 1, kind: input, shape index: {}]   ;;  %s1219_s2 = inlined_call_operand.vmem [shape: f32[1,128], index: 2, kind: input, shape index: {}]   ;;  %s1220_s3 = inlined_call_operand.hbm [shape: bf16[128,128], index: 3, kind: input, shape index: {}]   ;;  %s1221_s4 = inlined_call_operand.vmem [shape: f32[1,128], index: 4, kind: input, shape index: {}]   ;;  %s1222_s5 = inlined_call_operand.hbm [shape: f32[16,128], index: 5, kind: output, shape index: {}]  }
   0x1   :  { %12 = vsyncpa [#allocation3 + $0x1], 0 }
   0x2   :  { %13 = vsyncpa [#allocation6], 0 }
   0x3   :  { %14 = vsyncpa [#allocation4], 0 }
   0x4   :  { %16 = vsyncpa [#allocation4 + $0x1], 0  ;;  %s975_s18 = smov 0   ;;  %s977_s19 = smov 0  }
   0x5   :  { %s979_s20 = smov 0   ;;  %s981_s21 = smov 0  }
   0x6 LB: > { %s996_s22 = sadd.s32 4294967295, %s935_s21   ;;  %s600_s23 = sadd.s32 4294967294, %s935_s21   ;;  %s935_s21 = sphi %s981_s21, %s1242_s21   ;;  %s931_s20 = sphi %s979_s20, %s1241_s20   ;;  %s927_s19 = sphi %s977_s19, %s1240_s19   ;;  %s923_s18 = sphi %s975_s18, %s1239_s18  }
   0x7   : > { %p42_p0 = scmp.ne.s32.totalorder %s927_s19, %s923_s18  ;;  %p1223_p1 = scmp.eq.s32.totalorder %s996_s22, 0 }
   0x8   : > { %p156_p3 = scmp.eq.s32.totalorder %s600_s23, 1  ;;  %p601_p5 = scmp.ge.s32.totalorder %s935_s21, 1 }
   0x9   : > { %p1005_p4 = por %p1223_p1, %p42_p0  ;;  %p163_p7 = scmp.lt.s32.totalorder %s935_s21, 3 }
   0xa   : > { %p1010_p6 = por %p156_p3, %p42_p0  ;;  %s937_s27 = smov [#allocation5]  }
   0xb   : > { %s1226_s24 = scalar_select %p1005_p4, 1, 0 }
   0xc   : > { %s1227_s25 = scalar_select %p1010_p6, 1, 0 }
   0xd   : > { %p1015_p8 = pnand %p601_p5, %p163_p7  ;;  %s175_s28 = sshll.u32 %s937_s27, 4  ;;  %s1019_s28 = int_to_ptr.vmem [resolvable:$true] %s175_s28 }
   0xe   : > { %s938_s30 = smov [#allocation7]   ;;  %s779_s9 = scalar_lea.hbm %s1218_s1, 1024 }
   0xf   : > { %p704_p9 = pneg %p1015_p8  ;;  %s191_s6 = sshll.u32 %s938_s30, 4  ;;  %s1030_s6 = int_to_ptr.vmem [resolvable:$true] %s191_s6 }
  0x10   : > { %p780_p12 = scmp.ne.s32.totalorder %s1218_s1, %s779_s9  ;;  %p786_p5 = scmp.lt.u32.totalorder %s779_s9, %s1218_s1 }
  0x11   : > { %p1026_p11 = pnand %p704_p9, %p1223_p1 }
  0x13   : > { %p781_p13 = pneg %p1026_p11 }
  0x15   : > { %p782_p0 = pnand %p781_p13, %p780_p12 }
  0x17   : > { %p783_p3 = pneg %p782_p0 }
  0x19   : > { %p788_p7 = pnand %p786_p5, %p783_p3 }
  0x1b   : > { %791 = shalt.err (!%p788_p7)
}
  0x1c   : > { %s792_s14 = scalar_lea.vmem %s1019_s28, 1024  ;;  %p800_p2 = scmp.lt.s32.totalorder %s1019_s28, %s1019_s28 }
  0x1d   : > { %p793_p9 = scmp.ne.s32.totalorder %s1019_s28, %s792_s14  ;;  %p801_p12 = scmp.lt.s32.totalorder %s792_s14, %s792_s14 }
  0x1f   : > { %p795_p10 = pnand %p793_p9, %p781_p13  ;;  %p802_p0 = por %p801_p12, %p800_p2 }
  0x21   : > { %p796_p1 = pneg %p795_p10 }
  0x23   : > { %p803_p6 = pnand %p802_p0, %p796_p1 }
  0x25   : > { %806 = shalt.err (!%p803_p6)
}
  0x26   : > { %s939_s15 = smov 64   ;;  %s940_s16 = smov 4  }
  0x27   : > { %707 = dma.hbm_to_vmem [thread:$0]  (!%p1026_p11), %s1218_s1, 1024, %s1019_s28, [#allocation6], %s939_s15, %s939_s15, %s940_s16  }
  0x28   : > { %s807_s7 = scalar_lea.hbm %s1220_s3, 1024 }
  0x29   : > { %p808_p2 = scmp.ne.s32.totalorder %s1220_s3, %s807_s7  ;;  %p814_p10 = scmp.lt.u32.totalorder %s807_s7, %s1220_s3 }
  0x2b   : > { %p810_p1 = pnand %p808_p2, %p781_p13 }
  0x2d   : > { %p811_p6 = pneg %p810_p1 }
  0x2f   : > { %p816_p3 = pnand %p814_p10, %p811_p6 }
  0x31   : > { %819 = shalt.err (!%p816_p3)
}
  0x32   : > { %s820_s28 = scalar_lea.vmem %s1030_s6, 1024  ;;  %p828_p12 = scmp.lt.s32.totalorder %s1030_s6, %s1030_s6 }
  0x33   : > { %p821_p5 = scmp.ne.s32.totalorder %s1030_s6, %s820_s28  ;;  %p829_p0 = scmp.lt.s32.totalorder %s820_s28, %s820_s28 }
  0x35   : > { %p823_p7 = pnand %p821_p5, %p781_p13  ;;  %p830_p2 = por %p829_p0, %p828_p12 }
  0x37   : > { %p824_p9 = pneg %p823_p7 }
  0x39   : > { %p831_p1 = pnand %p830_p2, %p824_p9 }
  0x3b   : > { %834 = shalt.err (!%p831_p1)
}
  0x3c   : > { %710 = dma.hbm_to_vmem [thread:$0]  (!%p1026_p11), %s1220_s3, 1024, %s1030_s6, [#allocation6], %s939_s15, %s939_s15, %s940_s16  }
  0x3d   : > { %s1085_s14 = sadd.s32 1, %s935_s21   ;;  %s29_s29 = sadd.s32 1, %s931_s20 }
  0x3e   : > { %s26_s17 = ssub.s32 %s935_s21, %s1085_s14  ;;  %p36_p13 = scmp.ne.s32.totalorder %s931_s20, %s927_s19 }
  0x3f   : > { %p27_p6 = scmp.eq.s32.totalorder %s26_s17, 0  ;;  %p37_p10 = scmp.eq.s32.totalorder %s935_s21, 0 }
  0x40   : > { %p1230_p3 = scmp.eq.s32.totalorder %s996_s22, 1  ;;  %p721_p7 = scmp.lt.s32.totalorder %s935_s21, 2 }
  0x41   : > { %s1101_s27 = scalar_select %p27_p6, %s931_s20, %s29_s29  }
  0x42   : > { %p1095_p5 = por %p1230_p3, %p36_p13  ;;  %p38_p9 = por %p37_p10, %p36_p13 }
  0x43   : > { %s208_s30 = sand.u32 1, %s931_s20   ;;  %s606_s6 = sshll.u32 %s935_s21, 7 }
  0x44   : > { %s1231_s23 = scalar_select %p1095_p5, 1, 0 }
  0x45   : > { %s605_s7 = sshll.u32 %s208_s30, 3  ;;  %s1108_s8 = scalar_lea.hbm %s1217_s0, %s606_s6 }
  0x46   : > { %s212_s9 = scalar_lea.vmem [#allocation2], %s605_s7  ;;  %p1112_p11 = pnand %p721_p7, %p38_p9 }
  0x47   : > { %s219_s10 = sshll.u32 %s212_s9, 4  ;;  %s209_s28 = scalar_lea.sflag [#allocation3], %s208_s30  ;;  %s1110_s10 = int_to_ptr.vmem [resolvable:$true] %s219_s10 }
  0x48   : > { %s835_s12 = scalar_lea.hbm %s1108_s8, 128  ;;  %p837_p0 = pneg %p1112_p11 }
  0x49   : > { %p836_p12 = scmp.ne.s32.totalorder %s1108_s8, %s835_s12  ;;  %s840_s17 = scalar_lea.hbm %s1217_s0, 256 }
  0x4a   : > { %p841_p13 = scmp.lt.u32.totalorder %s1108_s8, %s1217_s0  ;;  %p842_p6 = scmp.lt.u32.totalorder %s840_s17, %s835_s12 }
  0x4b   : > { %p838_p2 = pnand %p837_p0, %p836_p12  ;;  %p844_p3 = scmp.lt.u32.totalorder %s835_s12, %s1108_s8 }
  0x4c   : > { %p843_p10 = por %p842_p6, %p841_p13 }
  0x4d   : > { %p839_p1 = pneg %p838_p2 }
  0x4e   : > { %p845_p7 = por %p844_p3, %p843_p10 }
  0x50   : > { %p846_p9 = pnand %p845_p7, %p839_p1 }
  0x52   : > { %849 = shalt.err (!%p846_p9)
}
  0x53   : > { %s850_s30 = scalar_lea.vmem %s1110_s10, 128  ;;  %s941_s15 = smov [#allocation2]  }
  0x54   : > { %p851_p12 = scmp.ne.s32.totalorder %s1110_s10, %s850_s30  ;;  %s855_s16 = sshll.u32 %s941_s15, 4  ;;  %s856_s16 = int_to_ptr.vmem [resolvable:$false] %s855_s16 }
  0x55   : > { %s857_s9 = scalar_lea.vmem %s856_s16, 256  ;;  %p858_p4 = scmp.lt.s32.totalorder %s1110_s10, %s856_s16 }
  0x56   : > { %p853_p2 = pnand %p851_p12, %p837_p0  ;;  %p859_p13 = scmp.lt.s32.totalorder %s857_s9, %s850_s30 }
  0x58   : > { %p854_p5 = pneg %p853_p2  ;;  %p860_p6 = por %p859_p13, %p858_p4 }
  0x5a   : > { %p861_p10 = pnand %p860_p6, %p854_p5 }
  0x5c   : > { %864 = shalt.err (!%p861_p10)
}
  0x5d   : > { %714 = dma.hbm_to_vmem [thread:$0]  (!%p1112_p11), %s1108_s8, 128, %s1110_s10, %s209_s28  }
  0x5e   : > { %228 = sbr.rel (%p1015_p8) target bundleno = 585 (0x249), region = 40  ;;  %s1144_s12 = sand.u32 (!%p1015_p8), 1, %s927_s19  }
  0x5f   : > { %s608_s13 = sshll.u32 (!%p1015_p8), %s1144_s12, 3  ;;  %s231_s29 = scalar_lea.sflag (!%p1015_p8), [#allocation3], %s1144_s12 }
  0x60   : > { %s1150_s17 = scalar_lea.vmem (!%p1015_p8), [#allocation2], %s608_s13  ;;  %p1233_p4 = scmp.ne.s32.totalorder (!%p1015_p8), %s1226_s24, 0 }
  0x65   : > { %910 = dma.done.wait (%p1233_p4), %s231_s29, 128  }
  0x66   : > { %912 = vsyncadd (%p1233_p4), %s231_s29, 4294967168  ;;  %p1234_p5 = scmp.eq.s32.totalorder %s996_s22, 0 }
  0x68   : > { %914 = dma.done.wait (%p1234_p5), [#allocation6], 2048   ;;  %p1235_p8 = pmov %p1234_p5 }
  0x69   : > { %v942_v0 = vmov 0.0   ;;  %vm943_vm0 = vmmov 0   ;;  %v763_v1 = vld [vmem:[#allocation5] sm:$0xff]   ;;  %v764_v2 = vld [vmem:[#allocation5 + $0x8] sm:$0xff]   ;;  %v765_v3 = vld [vmem:[#allocation5 + $0x10] sm:$0xff]   ;;  %s631_s11 = sshll.u32 %s996_s22, 7 }
  0x6a   : > { %916 = vsyncadd (%p1235_p8), [#allocation6], 4294965248  ;;  %652 = vmatprep.subr.bf16.mxu0 %v942_v0  ;;  %668 = vmatprep.mubr.msk.bf16.mxu0 %vm943_vm0, %v942_v0  ;;  %v771_v4 = vld [vmem:[#allocation7] sm:$0xff]   ;;  %v766_v5 = vld [vmem:[#allocation5 + $0x18] sm:$0xff]   ;;  %s268_s28 = scalar_lea.vmem [#allocation8], %s608_s13  ;;  %s1173_s15 = scalar_lea.hbm %s1222_s5, %s631_s11 }
  0x6b   : > { %672 = vmatprep.subr.bf16.mxu1 %v942_v0  ;;  %688 = vmatprep.mubr.msk.bf16.mxu1 %vm943_vm0, %v942_v0  ;;  %v772_v6 = vld [vmem:[#allocation7 + $0x8] sm:$0xff]   ;;  %v767_v7 = vld [vmem:[#allocation5 + $0x20] sm:$0xff]   ;;  %v773_v8 = vld [vmem:[#allocation7 + $0x10] sm:$0xff]   ;;  %s511_s7 = sshll.u32 %s268_s28, 4  ;;  %s498_s22 = scalar_lea.sflag [#allocation4], %s1144_s12  ;;  %s1175_s7 = int_to_ptr.vmem [resolvable:$true] %s511_s7 }
  0x6c   : > { %653 = vmatpush3.bf16.msra.mxu0 %v763_v1  ;;  %673 = vmatpush3.bf16.msra.mxu1 %v771_v4  ;;  %v768_v9 = vld [vmem:[#allocation5 + $0x28] sm:$0xff]   ;;  %v774_v10 = vld [vmem:[#allocation7 + $0x18] sm:$0xff]   ;;  %v769_v11 = vld [vmem:[#allocation5 + $0x30] sm:$0xff]   ;;  %s865_s16 = scalar_lea.vmem %s1175_s7, 128  ;;  %p1236_p0 = scmp.ne.s32.totalorder %s1231_s23, 0 }
  0x6d   : > { %654 = vmatprep.subr.bf16.mxu0 %v942_v0  ;;  %674 = vmatprep.subr.bf16.mxu1 %v942_v0  ;;  %v775_v12 = vld [vmem:[#allocation7 + $0x20] sm:$0xff]   ;;  %v770_v13 = vld [vmem:[#allocation5 + $0x38] sm:$0xff]   ;;  %v776_v15 = vld [vmem:[#allocation7 + $0x28] sm:$0xff]   ;;  %p866_p11 = scmp.ne.s32.totalorder %s1175_s7, %s865_s16  ;;  %s944_s9 = smov [#allocation8]  }
  0x6e   : > { %v270_v14 = vld [vmem:[%s1150_s17] sm:$0xff]  ;;  %s869_s13 = sshll.u32 %s944_s9, 4  ;;  %s870_s13 = int_to_ptr.vmem [resolvable:$false] %s869_s13 }
  0x6f   : > { %v271_v16 = vpack.c.bf16 %v270_v14, %v270_v14  ;;  %v777_v17 = vld [vmem:[#allocation7 + $0x30] sm:$0xff]   ;;  %v778_v18 = vld [vmem:[#allocation7 + $0x38] sm:$0xff]   ;;  %p867_p1 = pnand %p866_p11, %p1236_p0  ;;  %s871_s29 = scalar_lea.vmem %s870_s13, 256 }
  0x70   : > { %655 = vmatpush3.bf16.msra.mxu0 %v764_v2  ;;  %675 = vmatpush3.bf16.msra.mxu1 %v772_v6  ;;  %v612_v19 = vld [vmem:[%s1219_s2] ss:$0 sm:$0xff]  ;;  %p872_p7 = scmp.lt.s32.totalorder %s1175_s7, %s870_s13  ;;  %p873_p9 = scmp.lt.s32.totalorder %s871_s29, %s865_s16 }
  0x71   : > { %656 = vmatprep.subr.bf16.mxu0 %v942_v0  ;;  %676 = vmatprep.subr.bf16.mxu1 %v942_v0  ;;  %v621_v27 = vld [vmem:[%s1221_s4] ss:$0 sm:$0xff]  ;;  %p868_p3 = pneg %p867_p1 }
  0x72   : > { %p874_p12 = por %p873_p9, %p872_p7 }
  0x74   : > { %657 = vmatpush3.bf16.msra.mxu0 %v765_v3  ;;  %677 = vmatpush3.bf16.msra.mxu1 %v773_v8  ;;  %p875_p2 = pnand %p874_p12, %p868_p3 }
  0x75   : > { %658 = vmatprep.subr.bf16.mxu0 %v942_v0  ;;  %678 = vmatprep.subr.bf16.mxu1 %v942_v0 }
  0x78   : > { %659 = vmatpush3.bf16.msra.mxu0 %v766_v5  ;;  %679 = vmatpush3.bf16.msra.mxu1 %v774_v10 }
  0x79   : > { %660 = vmatprep.subr.bf16.mxu0 %v942_v0  ;;  %680 = vmatprep.subr.bf16.mxu1 %v942_v0 }
  0x7c   : > { %661 = vmatpush3.bf16.msra.mxu0 %v767_v7  ;;  %681 = vmatpush3.bf16.msra.mxu1 %v775_v12 }
  0x7d   : > { %662 = vmatprep.subr.bf16.mxu0 %v942_v0  ;;  %682 = vmatprep.subr.bf16.mxu1 %v942_v0 }
  0x80   : > { %663 = vmatpush3.bf16.msra.mxu0 %v768_v9  ;;  %683 = vmatpush3.bf16.msra.mxu1 %v776_v15 }
  0x81   : > { %664 = vmatprep.subr.bf16.mxu0 %v942_v0  ;;  %684 = vmatprep.subr.bf16.mxu1 %v942_v0 }
  0x84   : > { %665 = vmatpush3.bf16.msra.mxu0 %v769_v11  ;;  %685 = vmatpush3.bf16.msra.mxu1 %v777_v17 }
  0x85   : > { %666 = vmatprep.subr.bf16.mxu0 %v942_v0  ;;  %686 = vmatprep.subr.bf16.mxu1 %v942_v0 }
  0x88   : > { %667 = vmatpush3.bf16.msra.mxu0 %v770_v13  ;;  %687 = vmatpush3.bf16.msra.mxu1 %v778_v18 }
  0x8b   : > { %669 = vmatmul.mubr.bf16.vlgmr.msra.gmra.mrb[0].mxu0 %v271_v16 }
 0x15e   : > { %v377_v20 = vpop.f32.mrb[0].mxu0 }
 0x15f   : > { %v378_v21 = vadd.f32 %v612_v19, %v377_v20  ;;  %v670_v22 = vpop.f32.mrb[1].mxu0 }
 0x160   : > { %v380_v23 = vpop.f32.mrb[2].mxu0 }
 0x161   : > { %v383_v24 = vmax.f32 %v378_v21, 0.0  ;;  %v671_v25 = vpop.f32.mrb[3].mxu0 }
 0x163   : > { %v384_v26 = vpack.c.bf16 %v383_v24, %v383_v24 }
 0x165   : > { %689 = vmatmul.mubr.bf16.vlgmr.msra.gmra.mrb[0].mxu1 %v384_v26 }
 0x238   : > { %v490_v28 = vpop.f32.mrb[0].mxu1 }
 0x239   : > { %v491_v29 = vadd.f32 %v621_v27, %v490_v28  ;;  %v690_v30 = vpop.f32.mrb[1].mxu1 }
 0x23a   : > { %v493_v31 = vpop.f32.mrb[2].mxu1 }
 0x23b   : > { %496 = vst [vmem:[%s268_s28] sm:$0xff] %v491_v29  ;;  %v691_v32 = vpop.f32.mrb[3].mxu1 }
 0x23c   : > { %878 = shalt.err (!%p875_p2)
}
 0x23d   : > { %s879_s12 = scalar_lea.hbm %s1173_s15, 128  ;;  %s883_s26 = scalar_lea.hbm %s1222_s5, 256 }
 0x23e   : > { %p880_p13 = scmp.ne.s32.totalorder %s1173_s15, %s879_s12  ;;  %p884_p4 = scmp.lt.u32.totalorder %s1173_s15, %s1222_s5 }
 0x23f   : > { %p885_p5 = scmp.lt.u32.totalorder %s883_s26, %s879_s12  ;;  %p887_p11 = scmp.lt.u32.totalorder %s879_s12, %s1173_s15 }
 0x240   : > { %p881_p6 = pnand %p880_p13, %p1236_p0 }
 0x241   : > { %p886_p8 = por %p885_p5, %p884_p4 }
 0x242   : > { %p882_p10 = pneg %p881_p6 }
 0x243   : > { %p888_p1 = por %p887_p11, %p886_p8 }
 0x245   : > { %p889_p3 = pnand %p888_p1, %p882_p10 }
 0x247   : > { %892 = shalt.err (!%p889_p3)
}
 0x248   : > { %702 = dma.vmem_to_hbm [thread:$0]  (%p1236_p0), %s1175_s7, 128, %s1173_s15, %s498_s22  }
 0x249 PF: > { %s523_s11 = sand.u32 1, %s923_s18   ;;  %p1237_p7 = scmp.ne.s32.totalorder %s1227_s25, 0 }
 0x24a   : > { %p1238_p9 = scmp.ge.s32.totalorder %s935_s21, 2  ;;  %s524_s28 = scalar_lea.sflag [#allocation4], %s523_s11 }
 0x24c   : > { %p716_p12 = pnand %p1238_p9, %p1237_p7 }
 0x24e   : > { %918 = dma.done.wait (!%p716_p12), %s524_s28, 128  }
 0x24f   : > { %920 = vsyncadd (!%p716_p12), %s524_s28, 4294967168  ;;  %p19_p2 = scmp.ge.s32.totalorder %s1085_s14, 4   ;;  %s1239_s18 = smov %s927_s19 }
 0x250   : > { %s1240_s19 = smov %s931_s20  ;;  %s1241_s20 = smov %s1101_s27 }
 0x251   : > { %s1242_s21 = smov %s1085_s14  ;;  %21 = sbr.rel (!%p19_p2) target bundleno = 6 (0x6), region = 93 }
 0x258   :  { %529 = vsyncpa [#allocation3], 1 }
 0x259   :  { %531 = vsyncpa [#allocation3 + $0x1], 1 }
 0x25a   :  { %532 = vsyncpa [#allocation6], 1 }
 0x25b   :  { %533 = vsyncpa [#allocation4], 1 }
 0x25c   :  { %535 = vsyncpa [#allocation4 + $0x1], 1 }

// kernel: tpu_custom_call.1
= control target key start
LH: loop header
LB: loop body
LE: loop exit
PB: predicated region body
PF: predicated region fallthrough
CT: control target
= control target key end

     0   :  { %10 = vsyncpa [#allocation3], 0  ;;  %s1217_s0 = inlined_call_operand.hbm [shape: f32[16,128], index: 0, kind: input, shape index: {}]   ;;  %s1218_s1 = inlined_call_operand.hbm [shape: bf16[128,128], index: 1, kind: input, shape index: {}]   ;;  %s1219_s2 = inlined_call_operand.vmem [shape: f32[1,128], index: 2, kind: input, shape index: {}]   ;;  %s1220_s3 = inlined_call_operand.hbm [shape: bf16[128,128], index: 3, kind: input, shape index: {}]   ;;  %s1221_s4 = inlined_call_operand.vmem [shape: f32[1,128], index: 4, kind: input, shape index: {}]   ;;  %s1222_s5 = inlined_call_operand.hbm [shape: f32[16,128], index: 5, kind: output, shape index: {}]  }
   0x1   :  { %12 = vsyncpa [#allocation3 + $0x1], 0 }
   0x2   :  { %13 = vsyncpa [#allocation6], 0 }
   0x3   :  { %14 = vsyncpa [#allocation4], 0 }
   0x4   :  { %16 = vsyncpa [#allocation4 + $0x1], 0  ;;  %s975_s18 = smov 0   ;;  %s977_s19 = smov 0  }
   0x5   :  { %s979_s20 = smov 0   ;;  %s981_s21 = smov 0  }
   0x6 LB: > { %s996_s22 = sadd.s32 4294967295, %s935_s21   ;;  %s600_s23 = sadd.s32 4294967294, %s935_s21   ;;  %s935_s21 = sphi %s981_s21, %s1242_s21   ;;  %s931_s20 = sphi %s979_s20, %s1241_s20   ;;  %s927_s19 = sphi %s977_s19, %s1240_s19   ;;  %s923_s18 = sphi %s975_s18, %s1239_s18  }
   0x7   : > { %p42_p0 = scmp.ne.s32.totalorder %s927_s19, %s923_s18  ;;  %p1223_p1 = scmp.eq.s32.totalorder %s996_s22, 0 }
   0x8   : > { %p156_p3 = scmp.eq.s32.totalorder %s600_s23, 1  ;;  %p601_p5 = scmp.ge.s32.totalorder %s935_s21, 1 }
   0x9   : > { %p1005_p4 = por %p1223_p1, %p42_p0  ;;  %p163_p7 = scmp.lt.s32.totalorder %s935_s21, 3 }
   0xa   : > { %p1010_p6 = por %p156_p3, %p42_p0  ;;  %s937_s27 = smov [#allocation5]  }
   0xb   : > { %s1226_s24 = scalar_select %p1005_p4, 1, 0 }
   0xc   : > { %s1227_s25 = scalar_select %p1010_p6, 1, 0 }
   0xd   : > { %p1015_p8 = pnand %p601_p5, %p163_p7  ;;  %s175_s28 = sshll.u32 %s937_s27, 4  ;;  %s1019_s28 = int_to_ptr.vmem [resolvable:$true] %s175_s28 }
   0xe   : > { %s938_s30 = smov [#allocation7]   ;;  %s779_s9 = scalar_lea.hbm %s1218_s1, 1024 }
   0xf   : > { %p704_p9 = pneg %p1015_p8  ;;  %s191_s6 = sshll.u32 %s938_s30, 4  ;;  %s1030_s6 = int_to_ptr.vmem [resolvable:$true] %s191_s6 }
  0x10   : > { %p780_p12 = scmp.ne.s32.totalorder %s1218_s1, %s779_s9  ;;  %p786_p5 = scmp.lt.u32.totalorder %s779_s9, %s1218_s1 }
  0x11   : > { %p1026_p11 = pnand %p704_p9, %p1223_p1 }
  0x13   : > { %p781_p13 = pneg %p1026_p11 }
  0x15   : > { %p782_p0 = pnand %p781_p13, %p780_p12 }
  0x17   : > { %p783_p3 = pneg %p782_p0 }
  0x19   : > { %p788_p7 = pnand %p786_p5, %p783_p3 }
  0x1b   : > { %791 = shalt.err (!%p788_p7)
}
  0x1c   : > { %s792_s14 = scalar_lea.vmem %s1019_s28, 1024  ;;  %p800_p2 = scmp.lt.s32.totalorder %s1019_s28, %s1019_s28 }
  0x1d   : > { %p793_p9 = scmp.ne.s32.totalorder %s1019_s28, %s792_s14  ;;  %p801_p12 = scmp.lt.s32.totalorder %s792_s14, %s792_s14 }
  0x1f   : > { %p795_p10 = pnand %p793_p9, %p781_p13  ;;  %p802_p0 = por %p801_p12, %p800_p2 }
  0x21   : > { %p796_p1 = pneg %p795_p10 }
  0x23   : > { %p803_p6 = pnand %p802_p0, %p796_p1 }
  0x25   : > { %806 = shalt.err (!%p803_p6)
}
  0x26   : > { %s939_s15 = smov 64   ;;  %s940_s16 = smov 4  }
  0x27   : > { %707 = dma.hbm_to_vmem [thread:$0]  (!%p1026_p11), %s1218_s1, 1024, %s1019_s28, [#allocation6], %s939_s15, %s939_s15, %s940_s16  }
  0x28   : > { %s807_s7 = scalar_lea.hbm %s1220_s3, 1024 }
  0x29   : > { %p808_p2 = scmp.ne.s32.totalorder %s1220_s3, %s807_s7  ;;  %p814_p10 = scmp.lt.u32.totalorder %s807_s7, %s1220_s3 }
  0x2b   : > { %p810_p1 = pnand %p808_p2, %p781_p13 }
  0x2d   : > { %p811_p6 = pneg %p810_p1 }
  0x2f   : > { %p816_p3 = pnand %p814_p10, %p811_p6 }
  0x31   : > { %819 = shalt.err (!%p816_p3)
}
  0x32   : > { %s820_s28 = scalar_lea.vmem %s1030_s6, 1024  ;;  %p828_p12 = scmp.lt.s32.totalorder %s1030_s6, %s1030_s6 }
  0x33   : > { %p821_p5 = scmp.ne.s32.totalorder %s1030_s6, %s820_s28  ;;  %p829_p0 = scmp.lt.s32.totalorder %s820_s28, %s820_s28 }
  0x35   : > { %p823_p7 = pnand %p821_p5, %p781_p13  ;;  %p830_p2 = por %p829_p0, %p828_p12 }
  0x37   : > { %p824_p9 = pneg %p823_p7 }
  0x39   : > { %p831_p1 = pnand %p830_p2, %p824_p9 }
  0x3b   : > { %834 = shalt.err (!%p831_p1)
}
  0x3c   : > { %710 = dma.hbm_to_vmem [thread:$0]  (!%p1026_p11), %s1220_s3, 1024, %s1030_s6, [#allocation6], %s939_s15, %s939_s15, %s940_s16  }
  0x3d   : > { %s1085_s14 = sadd.s32 1, %s935_s21   ;;  %s29_s29 = sadd.s32 1, %s931_s20 }
  0x3e   : > { %s26_s17 = ssub.s32 %s935_s21, %s1085_s14  ;;  %p36_p13 = scmp.ne.s32.totalorder %s931_s20, %s927_s19 }
  0x3f   : > { %p27_p6 = scmp.eq.s32.totalorder %s26_s17, 0  ;;  %p37_p10 = scmp.eq.s32.totalorder %s935_s21, 0 }
  0x40   : > { %p1230_p3 = scmp.eq.s32.totalorder %s996_s22, 1  ;;  %p721_p7 = scmp.lt.s32.totalorder %s935_s21, 2 }
  0x41   : > { %s1101_s27 = scalar_select %p27_p6, %s931_s20, %s29_s29  }
  0x42   : > { %p1095_p5 = por %p1230_p3, %p36_p13  ;;  %p38_p9 = por %p37_p10, %p36_p13 }
  0x43   : > { %s208_s30 = sand.u32 1, %s931_s20   ;;  %s606_s6 = sshll.u32 %s935_s21, 7 }
  0x44   : > { %s1231_s23 = scalar_select %p1095_p5, 1, 0 }
  0x45   : > { %s605_s7 = sshll.u32 %s208_s30, 3  ;;  %s1108_s8 = scalar_lea.hbm %s1217_s0, %s606_s6 }
  0x46   : > { %s212_s9 = scalar_lea.vmem [#allocation2], %s605_s7  ;;  %p1112_p11 = pnand %p721_p7, %p38_p9 }
  0x47   : > { %s219_s10 = sshll.u32 %s212_s9, 4  ;;  %s209_s28 = scalar_lea.sflag [#allocation3], %s208_s30  ;;  %s1110_s10 = int_to_ptr.vmem [resolvable:$true] %s219_s10 }
  0x48   : > { %s835_s12 = scalar_lea.hbm %s1108_s8, 128  ;;  %p837_p0 = pneg %p1112_p11 }
  0x49   : > { %p836_p12 = scmp.ne.s32.totalorder %s1108_s8, %s835_s12  ;;  %s840_s17 = scalar_lea.hbm %s1217_s0, 256 }
  0x4a   : > { %p841_p13 = scmp.lt.u32.totalorder %s1108_s8, %s1217_s0  ;;  %p842_p6 = scmp.lt.u32.totalorder %s840_s17, %s835_s12 }
  0x4b   : > { %p838_p2 = pnand %p837_p0, %p836_p12  ;;  %p844_p3 = scmp.lt.u32.totalorder %s835_s12, %s1108_s8 }
  0x4c   : > { %p843_p10 = por %p842_p6, %p841_p13 }
  0x4d   : > { %p839_p1 = pneg %p838_p2 }
  0x4e   : > { %p845_p7 = por %p844_p3, %p843_p10 }
  0x50   : > { %p846_p9 = pnand %p845_p7, %p839_p1 }
  0x52   : > { %849 = shalt.err (!%p846_p9)
}
  0x53   : > { %s850_s30 = scalar_lea.vmem %s1110_s10, 128  ;;  %s941_s15 = smov [#allocation2]  }
  0x54   : > { %p851_p12 = scmp.ne.s32.totalorder %s1110_s10, %s850_s30  ;;  %s855_s16 = sshll.u32 %s941_s15, 4  ;;  %s856_s16 = int_to_ptr.vmem [resolvable:$false] %s855_s16 }
  0x55   : > { %s857_s9 = scalar_lea.vmem %s856_s16, 256  ;;  %p858_p4 = scmp.lt.s32.totalorder %s1110_s10, %s856_s16 }
  0x56   : > { %p853_p2 = pnand %p851_p12, %p837_p0  ;;  %p859_p13 = scmp.lt.s32.totalorder %s857_s9, %s850_s30 }
  0x58   : > { %p854_p5 = pneg %p853_p2  ;;  %p860_p6 = por %p859_p13, %p858_p4 }
  0x5a   : > { %p861_p10 = pnand %p860_p6, %p854_p5 }
  0x5c   : > { %864 = shalt.err (!%p861_p10)
}
  0x5d   : > { %714 = dma.hbm_to_vmem [thread:$0]  (!%p1112_p11), %s1108_s8, 128, %s1110_s10, %s209_s28  }
  0x5e   : > { %228 = sbr.rel (%p1015_p8) target bundleno = 585 (0x249), region = 40  ;;  %s1144_s12 = sand.u32 (!%p1015_p8), 1, %s927_s19  }
  0x5f   : > { %s608_s13 = sshll.u32 (!%p1015_p8), %s1144_s12, 3  ;;  %s231_s29 = scalar_lea.sflag (!%p1015_p8), [#allocation3], %s1144_s12 }
  0x60   : > { %s1150_s17 = scalar_lea.vmem (!%p1015_p8), [#allocation2], %s608_s13  ;;  %p1233_p4 = scmp.ne.s32.totalorder (!%p1015_p8), %s1226_s24, 0 }
  0x65   : > { %910 = dma.done.wait (%p1233_p4), %s231_s29, 128  }
  0x66   : > { %912 = vsyncadd (%p1233_p4), %s231_s29, 4294967168  ;;  %p1234_p5 = scmp.eq.s32.totalorder %s996_s22, 0 }
  0x68   : > { %914 = dma.done.wait (%p1234_p5), [#allocation6], 2048   ;;  %p1235_p8 = pmov %p1234_p5 }
  0x69   : > { %v942_v0 = vmov 0.0   ;;  %vm943_vm0 = vmmov 0   ;;  %v763_v1 = vld [vmem:[#allocation5] sm:$0xff]   ;;  %v764_v2 = vld [vmem:[#allocation5 + $0x8] sm:$0xff]   ;;  %v765_v3 = vld [vmem:[#allocation5 + $0x10] sm:$0xff]   ;;  %s631_s11 = sshll.u32 %s996_s22, 7 }
  0x6a   : > { %916 = vsyncadd (%p1235_p8), [#allocation6], 4294965248  ;;  %652 = vmatprep.subr.bf16.mxu0 %v942_v0  ;;  %668 = vmatprep.mubr.msk.bf16.mxu0 %vm943_vm0, %v942_v0  ;;  %v771_v4 = vld [vmem:[#allocation7] sm:$0xff]   ;;  %v766_v5 = vld [vmem:[#allocation5 + $0x18] sm:$0xff]   ;;  %s268_s28 = scalar_lea.vmem [#allocation8], %s608_s13  ;;  %s1173_s15 = scalar_lea.hbm %s1222_s5, %s631_s11 }
  0x6b   : > { %672 = vmatprep.subr.bf16.mxu1 %v942_v0  ;;  %688 = vmatprep.mubr.msk.bf16.mxu1 %vm943_vm0, %v942_v0  ;;  %v772_v6 = vld [vmem:[#allocation7 + $0x8] sm:$0xff]   ;;  %v767_v7 = vld [vmem:[#allocation5 + $0x20] sm:$0xff]   ;;  %v773_v8 = vld [vmem:[#allocation7 + $0x10] sm:$0xff]   ;;  %s511_s7 = sshll.u32 %s268_s28, 4  ;;  %s498_s22 = scalar_lea.sflag [#allocation4], %s1144_s12  ;;  %s1175_s7 = int_to_ptr.vmem [resolvable:$true] %s511_s7 }
  0x6c   : > { %653 = vmatpush3.bf16.msra.mxu0 %v763_v1  ;;  %673 = vmatpush3.bf16.msra.mxu1 %v771_v4  ;;  %v768_v9 = vld [vmem:[#allocation5 + $0x28] sm:$0xff]   ;;  %v774_v10 = vld [vmem:[#allocation7 + $0x18] sm:$0xff]   ;;  %v769_v11 = vld [vmem:[#allocation5 + $0x30] sm:$0xff]   ;;  %s865_s16 = scalar_lea.vmem %s1175_s7, 128  ;;  %p1236_p0 = scmp.ne.s32.totalorder %s1231_s23, 0 }
  0x6d   : > { %654 = vmatprep.subr.bf16.mxu0 %v942_v0  ;;  %674 = vmatprep.subr.bf16.mxu1 %v942_v0  ;;  %v775_v12 = vld [vmem:[#allocation7 + $0x20] sm:$0xff]   ;;  %v770_v13 = vld [vmem:[#allocation5 + $0x38] sm:$0xff]   ;;  %v776_v15 = vld [vmem:[#allocation7 + $0x28] sm:$0xff]   ;;  %p866_p11 = scmp.ne.s32.totalorder %s1175_s7, %s865_s16  ;;  %s944_s9 = smov [#allocation8]  }
  0x6e   : > { %v270_v14 = vld [vmem:[%s1150_s17] sm:$0xff]  ;;  %s869_s13 = sshll.u32 %s944_s9, 4  ;;  %s870_s13 = int_to_ptr.vmem [resolvable:$false] %s869_s13 }
  0x6f   : > { %v271_v16 = vpack.c.bf16 %v270_v14, %v270_v14  ;;  %v777_v17 = vld [vmem:[#allocation7 + $0x30] sm:$0xff]   ;;  %v778_v18 = vld [vmem:[#allocation7 + $0x38] sm:$0xff]   ;;  %p867_p1 = pnand %p866_p11, %p1236_p0  ;;  %s871_s29 = scalar_lea.vmem %s870_s13, 256 }
  0x70   : > { %655 = vmatpush3.bf16.msra.mxu0 %v764_v2  ;;  %675 = vmatpush3.bf16.msra.mxu1 %v772_v6  ;;  %v612_v19 = vld [vmem:[%s1219_s2] ss:$0 sm:$0xff]  ;;  %p872_p7 = scmp.lt.s32.totalorder %s1175_s7, %s870_s13  ;;  %p873_p9 = scmp.lt.s32.totalorder %s871_s29, %s865_s16 }
  0x71   : > { %656 = vmatprep.subr.bf16.mxu0 %v942_v0  ;;  %676 = vmatprep.subr.bf16.mxu1 %v942_v0  ;;  %v621_v27 = vld [vmem:[%s1221_s4] ss:$0 sm:$0xff]  ;;  %p868_p3 = pneg %p867_p1 }
  0x72   : > { %p874_p12 = por %p873_p9, %p872_p7 }
  0x74   : > { %657 = vmatpush3.bf16.msra.mxu0 %v765_v3  ;;  %677 = vmatpush3.bf16.msra.mxu1 %v773_v8  ;;  %p875_p2 = pnand %p874_p12, %p868_p3 }
  0x75   : > { %658 = vmatprep.subr.bf16.mxu0 %v942_v0  ;;  %678 = vmatprep.subr.bf16.mxu1 %v942_v0 }
  0x78   : > { %659 = vmatpush3.bf16.msra.mxu0 %v766_v5  ;;  %679 = vmatpush3.bf16.msra.mxu1 %v774_v10 }
  0x79   : > { %660 = vmatprep.subr.bf16.mxu0 %v942_v0  ;;  %680 = vmatprep.subr.bf16.mxu1 %v942_v0 }
  0x7c   : > { %661 = vmatpush3.bf16.msra.mxu0 %v767_v7  ;;  %681 = vmatpush3.bf16.msra.mxu1 %v775_v12 }
  0x7d   : > { %662 = vmatprep.subr.bf16.mxu0 %v942_v0  ;;  %682 = vmatprep.subr.bf16.mxu1 %v942_v0 }
  0x80   : > { %663 = vmatpush3.bf16.msra.mxu0 %v768_v9  ;;  %683 = vmatpush3.bf16.msra.mxu1 %v776_v15 }
  0x81   : > { %664 = vmatprep.subr.bf16.mxu0 %v942_v0  ;;  %684 = vmatprep.subr.bf16.mxu1 %v942_v0 }
  0x84   : > { %665 = vmatpush3.bf16.msra.mxu0 %v769_v11  ;;  %685 = vmatpush3.bf16.msra.mxu1 %v777_v17 }
  0x85   : > { %666 = vmatprep.subr.bf16.mxu0 %v942_v0  ;;  %686 = vmatprep.subr.bf16.mxu1 %v942_v0 }
  0x88   : > { %667 = vmatpush3.bf16.msra.mxu0 %v770_v13  ;;  %687 = vmatpush3.bf16.msra.mxu1 %v778_v18 }
  0x8b   : > { %669 = vmatmul.mubr.bf16.vlgmr.msra.gmra.mrb[0].mxu0 %v271_v16 }
 0x15e   : > { %v377_v20 = vpop.f32.mrb[0].mxu0 }
 0x15f   : > { %v378_v21 = vadd.f32 %v612_v19, %v377_v20  ;;  %v670_v22 = vpop.f32.mrb[1].mxu0 }
 0x160   : > { %v380_v23 = vpop.f32.mrb[2].mxu0 }
 0x161   : > { %v383_v24 = vmax.f32 %v378_v21, 0.0  ;;  %v671_v25 = vpop.f32.mrb[3].mxu0 }
 0x163   : > { %v384_v26 = vpack.c.bf16 %v383_v24, %v383_v24 }
 0x165   : > { %689 = vmatmul.mubr.bf16.vlgmr.msra.gmra.mrb[0].mxu1 %v384_v26 }
 0x238   : > { %v490_v28 = vpop.f32.mrb[0].mxu1 }
 0x239   : > { %v491_v29 = vadd.f32 %v621_v27, %v490_v28  ;;  %v690_v30 = vpop.f32.mrb[1].mxu1 }
 0x23a   : > { %v493_v31 = vpop.f32.mrb[2].mxu1 }
 0x23b   : > { %496 = vst [vmem:[%s268_s28] sm:$0xff] %v491_v29  ;;  %v691_v32 = vpop.f32.mrb[3].mxu1 }
 0x23c   : > { %878 = shalt.err (!%p875_p2)
}
 0x23d   : > { %s879_s12 = scalar_lea.hbm %s1173_s15, 128  ;;  %s883_s26 = scalar_lea.hbm %s1222_s5, 256 }
 0x23e   : > { %p880_p13 = scmp.ne.s32.totalorder %s1173_s15, %s879_s12  ;;  %p884_p4 = scmp.lt.u32.totalorder %s1173_s15, %s1222_s5 }
 0x23f   : > { %p885_p5 = scmp.lt.u32.totalorder %s883_s26, %s879_s12  ;;  %p887_p11 = scmp.lt.u32.totalorder %s879_s12, %s1173_s15 }
 0x240   : > { %p881_p6 = pnand %p880_p13, %p1236_p0 }
 0x241   : > { %p886_p8 = por %p885_p5, %p884_p4 }
 0x242   : > { %p882_p10 = pneg %p881_p6 }
 0x243   : > { %p888_p1 = por %p887_p11, %p886_p8 }
 0x245   : > { %p889_p3 = pnand %p888_p1, %p882_p10 }
 0x247   : > { %892 = shalt.err (!%p889_p3)
}
 0x248   : > { %702 = dma.vmem_to_hbm [thread:$0]  (%p1236_p0), %s1175_s7, 128, %s1173_s15, %s498_s22  }
 0x249 PF: > { %s523_s11 = sand.u32 1, %s923_s18   ;;  %p1237_p7 = scmp.ne.s32.totalorder %s1227_s25, 0 }
 0x24a   : > { %p1238_p9 = scmp.ge.s32.totalorder %s935_s21, 2  ;;  %s524_s28 = scalar_lea.sflag [#allocation4], %s523_s11 }
 0x24c   : > { %p716_p12 = pnand %p1238_p9, %p1237_p7 }
 0x24e   : > { %918 = dma.done.wait (!%p716_p12), %s524_s28, 128  }
 0x24f   : > { %920 = vsyncadd (!%p716_p12), %s524_s28, 4294967168  ;;  %p19_p2 = scmp.ge.s32.totalorder %s1085_s14, 4   ;;  %s1239_s18 = smov %s927_s19 }
 0x250   : > { %s1240_s19 = smov %s931_s20  ;;  %s1241_s20 = smov %s1101_s27 }
 0x251   : > { %s1242_s21 = smov %s1085_s14  ;;  %21 = sbr.rel (!%p19_p2) target bundleno = 6 (0x6), region = 93 }
 0x258   :  { %529 = vsyncpa [#allocation3], 1 }
 0x259   :  { %531 = vsyncpa [#allocation3 + $0x1], 1 }
 0x25a   :  { %532 = vsyncpa [#allocation6], 1 }
 0x25b   :  { %533 = vsyncpa [#allocation4], 1 }
 0x25c   :  { %535 = vsyncpa [#allocation4 + $0x1], 1 }

</bundles_post_ra>
